<compile_context>
chip_gen: v5e
topology: v5e:2x2
jax: 0.10.0
libtpu: 0.0.40
codegen_flags: <defaults>
</compile_context>

<pallas_src>
import jax
import jax.numpy as jnp
from jax.experimental import pallas as pl
from jax.experimental.pallas import tpu as pltpu


def _round_up(n, m):
    return ((n + m - 1) // m) * m


def _mlp_kernel(x_ref, w1_ref, b1_ref, w2_ref, b2_ref, w3_ref, b3_ref, o_ref):
    """Fused MLP on one lane-dense (features, TILE_B) activation tile."""
    tb = x_ref.shape[-1]

    def layer(w, b, act, *, relu):
        # w: (out, k), b: (out, 1), act: (k, tb) -> (out, tb)
        out_f, k = w.shape
        acc = jnp.broadcast_to(b, (out_f, tb))            # bias seeds accumulator
        for kk in range(k):                               # static unroll, K is tiny
            acc = acc + w[:, kk:kk + 1] * act[kk:kk + 1, :]   # VPU broadcast-FMA
        return jnp.maximum(acc, 0.0) if relu else acc

    x = x_ref[...]                                        # (3,  TILE_B)
    h1 = layer(w1_ref[...], b1_ref[...], x, relu=True)    # (16, TILE_B)
    h2 = layer(w2_ref[...], b2_ref[...], h1, relu=True)   # (8,  TILE_B)
    o_ref[...] = layer(w3_ref[...], b3_ref[...], h2, relu=False)  # (1, TILE_B)


def eco_score_forward(x, params, *, tile_b=2048):
    """x: (B, 3) float32.  params: PyTorch-layout weights wN (out, in), biases bN (out, 1).

    Returns (B, 1) float32 scores identical to EcoScoreModel.forward.
    """
    # TODO(synk): for genuinely tiny B (e.g. a handful of score requests), plain
    # jnp under jit beats any kernel; batch requests before calling this.
    B = x.shape[0]
    x = x.astype(jnp.float32)

    # Batch on the lane axis; tile batch so x / out stream while weights stay resident.
    tile = max(128, min(tile_b, _round_up(B, 128)))       # multiple of 128, fits VMEM easily
    b_pad = _round_up(B, tile)
    xt = jnp.pad(x.T, ((0, 0), (0, b_pad - B)))           # (3, B_pad), layout plumbing only

    stream_spec = lambda rows: pl.BlockSpec((rows, tile), lambda i: (0, i))
    pinned = lambda shape: pl.BlockSpec(shape, lambda i: (0, 0))   # whole-array, VMEM-resident

    out_t = pl.pallas_call(
        _mlp_kernel,
        out_shape=jax.ShapeDtypeStruct((1, b_pad), jnp.float32),
        grid_spec=pltpu.PrefetchScalarGridSpec(
            num_scalar_prefetch=0,
            grid=(b_pad // tile,),
            in_specs=[
                stream_spec(3),                 # x^T tile (3, TILE_B) — streamed/pipelined
                pinned((16, 3)), pinned((16, 1)),
                pinned((8, 16)), pinned((8, 1)),
                pinned((1, 8)),  pinned((1, 1)),
            ],
            out_specs=stream_spec(1),           # lane-dense (1, TILE_B) output tile
        ),
        compiler_params=pltpu.CompilerParams(
            # Batch tiles are independent: shard across both TensorCores on v7x.
            dimension_semantics=("parallel",),
        ),
    )(xt, params["w1"], params["b1"], params["w2"], params["b2"],
      params["w3"], params["b3"])

    return out_t[:, :B].T                                  # (B, 1)


def eco_score_reference(x, params):
    """Pure-JAX reference matching the PyTorch module."""
    h1 = jnp.maximum(x @ params["w1"].T + params["b1"].T, 0.0)
    h2 = jnp.maximum(h1 @ params["w2"].T + params["b2"].T, 0.0)
    return h2 @ params["w3"].T + params["b3"].T


def init_params(key):
    """Deterministic init mirroring nn.Linear default: U(-1/sqrt(fan_in), 1/sqrt(fan_in)).

    Weights stored in PyTorch layout (out, in); biases as (out, 1).
    """
    dims = [(3, 16), (16, 8), (8, 1)]
    params = {}
    keys = jax.random.split(key, 2 * len(dims))
    for i, (fan_in, fan_out) in enumerate(dims):
        bound = 1.0 / jnp.sqrt(fan_in)
        w = jax.random.uniform(keys[2 * i], (fan_out, fan_in), jnp.float32, -bound, bound)
        b = jax.random.uniform(keys[2 * i + 1], (fan_out, 1), jnp.float32, -bound, bound)
        params[f"w{i + 1}"] = w
        params[f"b{i + 1}"] = b
    return params


if __name__ == "__main__":
    key = jax.random.PRNGKey(0)
    pkey, xkey = jax.random.split(key)
    params = init_params(pkey)

    B = 8  # small batch of eco-feature vectors, each with 3 features
    x = jax.random.normal(xkey, (B, 3), jnp.float32)

    out = eco_score_forward(x, params)
    out = jax.block_until_ready(out)

    ref = eco_score_reference(x, params)
    assert out.shape == (B, 1)
    assert jnp.allclose(out, ref, atol=1e-5, rtol=1e-5)

    print("KERNEL_OK")
</pallas_src>

<mosaic_0001>
module attributes {stable_mosaic.version = 11 : i64} {
  func.func @_mlp_kernel(%arg0: i32, %arg1: memref<3x128xf32, #tpu.memory_space<vmem>>, %arg2: memref<16x3xf32, #tpu.memory_space<vmem>>, %arg3: memref<16x1xf32, #tpu.memory_space<vmem>>, %arg4: memref<8x16xf32, #tpu.memory_space<vmem>>, %arg5: memref<8x1xf32, #tpu.memory_space<vmem>>, %arg6: memref<1x8xf32, #tpu.memory_space<vmem>>, %arg7: memref<1x1xf32, #tpu.memory_space<vmem>>, %arg8: memref<1x128xf32, #tpu.memory_space<vmem>>) attributes {dimension_semantics = [#tpu.dimension_semantics<parallel>], iteration_bounds = array<i64: 1>, scalar_prefetch = 0 : i64, scratch_operands = 0 : i64, tpu.core_type = #tpu.core_type<tc>, window_params = [{transform_indices = @transform_0, window_bounds = array<i64: 3, 128>}, {pipeline_mode = #tpu.pipeline_mode<synchronous>, transform_indices = @transform_1, window_bounds = array<i64: 16, 3>}, {pipeline_mode = #tpu.pipeline_mode<synchronous>, transform_indices = @transform_2, window_bounds = array<i64: 16, 1>}, {pipeline_mode = #tpu.pipeline_mode<synchronous>, transform_indices = @transform_3, window_bounds = array<i64: 8, 16>}, {pipeline_mode = #tpu.pipeline_mode<synchronous>, transform_indices = @transform_4, window_bounds = array<i64: 8, 1>}, {pipeline_mode = #tpu.pipeline_mode<synchronous>, transform_indices = @transform_5, window_bounds = array<i64: 1, 8>}, {pipeline_mode = #tpu.pipeline_mode<synchronous>, transform_indices = @transform_6, window_bounds = array<i64: 1, 1>}, {transform_indices = @transform_7, window_bounds = array<i64: 1, 128>}]} {
    %c0 = arith.constant 0 : index
    %c0_0 = arith.constant 0 : index
    %0 = vector.load %arg1[%c0, %c0_0] : memref<3x128xf32, #tpu.memory_space<vmem>>, vector<3x128xf32>
    %c0_1 = arith.constant 0 : index
    %c0_2 = arith.constant 0 : index
    %1 = vector.load %arg2[%c0_1, %c0_2] : memref<16x3xf32, #tpu.memory_space<vmem>>, vector<16x3xf32>
    %c0_3 = arith.constant 0 : index
    %c0_4 = arith.constant 0 : index
    %2 = vector.load %arg3[%c0_3, %c0_4] : memref<16x1xf32, #tpu.memory_space<vmem>>, vector<16x1xf32>
    %3 = vector.shape_cast %2 : vector<16x1xf32> to vector<16x1xf32>
    %4 = vector.broadcast %3 : vector<16x1xf32> to vector<16x128xf32>
    %5 = vector.extract_strided_slice %1 {offsets = [0, 0], sizes = [16, 1], strides = [1, 1]} : vector<16x3xf32> to vector<16x1xf32>
    %6 = vector.extract_strided_slice %0 {offsets = [0, 0], sizes = [1, 128], strides = [1, 1]} : vector<3x128xf32> to vector<1x128xf32>
    %7 = vector.broadcast %5 : vector<16x1xf32> to vector<16x128xf32>
    %8 = vector.broadcast %6 : vector<1x128xf32> to vector<16x128xf32>
    %9 = arith.mulf %7, %8 : vector<16x128xf32>
    %10 = arith.addf %4, %9 : vector<16x128xf32>
    %11 = vector.extract_strided_slice %1 {offsets = [0, 1], sizes = [16, 1], strides = [1, 1]} : vector<16x3xf32> to vector<16x1xf32>
    %12 = vector.extract_strided_slice %0 {offsets = [1, 0], sizes = [1, 128], strides = [1, 1]} : vector<3x128xf32> to vector<1x128xf32>
    %13 = vector.broadcast %11 : vector<16x1xf32> to vector<16x128xf32>
    %14 = vector.broadcast %12 : vector<1x128xf32> to vector<16x128xf32>
    %15 = arith.mulf %13, %14 : vector<16x128xf32>
    %16 = arith.addf %10, %15 : vector<16x128xf32>
    %17 = vector.extract_strided_slice %1 {offsets = [0, 2], sizes = [16, 1], strides = [1, 1]} : vector<16x3xf32> to vector<16x1xf32>
    %18 = vector.extract_strided_slice %0 {offsets = [2, 0], sizes = [1, 128], strides = [1, 1]} : vector<3x128xf32> to vector<1x128xf32>
    %19 = vector.broadcast %17 : vector<16x1xf32> to vector<16x128xf32>
    %20 = vector.broadcast %18 : vector<1x128xf32> to vector<16x128xf32>
    %21 = arith.mulf %19, %20 : vector<16x128xf32>
    %22 = arith.addf %16, %21 : vector<16x128xf32>
    %cst = arith.constant 0.000000e+00 : f32
    %23 = vector.broadcast %cst : f32 to vector<16x128xf32>
    %24 = arith.maximumf %22, %23 : vector<16x128xf32>
    %c0_5 = arith.constant 0 : index
    %c0_6 = arith.constant 0 : index
    %25 = vector.load %arg4[%c0_5, %c0_6] : memref<8x16xf32, #tpu.memory_space<vmem>>, vector<8x16xf32>
    %c0_7 = arith.constant 0 : index
    %c0_8 = arith.constant 0 : index
    %26 = vector.load %arg5[%c0_7, %c0_8] : memref<8x1xf32, #tpu.memory_space<vmem>>, vector<8x1xf32>
    %27 = vector.shape_cast %26 : vector<8x1xf32> to vector<8x1xf32>
    %28 = vector.broadcast %27 : vector<8x1xf32> to vector<8x128xf32>
    %29 = vector.extract_strided_slice %25 {offsets = [0, 0], sizes = [8, 1], strides = [1, 1]} : vector<8x16xf32> to vector<8x1xf32>
    %30 = vector.extract_strided_slice %24 {offsets = [0, 0], sizes = [1, 128], strides = [1, 1]} : vector<16x128xf32> to vector<1x128xf32>
    %31 = vector.broadcast %29 : vector<8x1xf32> to vector<8x128xf32>
    %32 = vector.broadcast %30 : vector<1x128xf32> to vector<8x128xf32>
    %33 = arith.mulf %31, %32 : vector<8x128xf32>
    %34 = arith.addf %28, %33 : vector<8x128xf32>
    %35 = vector.extract_strided_slice %25 {offsets = [0, 1], sizes = [8, 1], strides = [1, 1]} : vector<8x16xf32> to vector<8x1xf32>
    %36 = vector.extract_strided_slice %24 {offsets = [1, 0], sizes = [1, 128], strides = [1, 1]} : vector<16x128xf32> to vector<1x128xf32>
    %37 = vector.broadcast %35 : vector<8x1xf32> to vector<8x128xf32>
    %38 = vector.broadcast %36 : vector<1x128xf32> to vector<8x128xf32>
    %39 = arith.mulf %37, %38 : vector<8x128xf32>
    %40 = arith.addf %34, %39 : vector<8x128xf32>
    %41 = vector.extract_strided_slice %25 {offsets = [0, 2], sizes = [8, 1], strides = [1, 1]} : vector<8x16xf32> to vector<8x1xf32>
    %42 = vector.extract_strided_slice %24 {offsets = [2, 0], sizes = [1, 128], strides = [1, 1]} : vector<16x128xf32> to vector<1x128xf32>
    %43 = vector.broadcast %41 : vector<8x1xf32> to vector<8x128xf32>
    %44 = vector.broadcast %42 : vector<1x128xf32> to vector<8x128xf32>
    %45 = arith.mulf %43, %44 : vector<8x128xf32>
    %46 = arith.addf %40, %45 : vector<8x128xf32>
    %47 = vector.extract_strided_slice %25 {offsets = [0, 3], sizes = [8, 1], strides = [1, 1]} : vector<8x16xf32> to vector<8x1xf32>
    %48 = vector.extract_strided_slice %24 {offsets = [3, 0], sizes = [1, 128], strides = [1, 1]} : vector<16x128xf32> to vector<1x128xf32>
    %49 = vector.broadcast %47 : vector<8x1xf32> to vector<8x128xf32>
    %50 = vector.broadcast %48 : vector<1x128xf32> to vector<8x128xf32>
    %51 = arith.mulf %49, %50 : vector<8x128xf32>
    %52 = arith.addf %46, %51 : vector<8x128xf32>
    %53 = vector.extract_strided_slice %25 {offsets = [0, 4], sizes = [8, 1], strides = [1, 1]} : vector<8x16xf32> to vector<8x1xf32>
    %54 = vector.extract_strided_slice %24 {offsets = [4, 0], sizes = [1, 128], strides = [1, 1]} : vector<16x128xf32> to vector<1x128xf32>
    %55 = vector.broadcast %53 : vector<8x1xf32> to vector<8x128xf32>
    %56 = vector.broadcast %54 : vector<1x128xf32> to vector<8x128xf32>
    %57 = arith.mulf %55, %56 : vector<8x128xf32>
    %58 = arith.addf %52, %57 : vector<8x128xf32>
    %59 = vector.extract_strided_slice %25 {offsets = [0, 5], sizes = [8, 1], strides = [1, 1]} : vector<8x16xf32> to vector<8x1xf32>
    %60 = vector.extract_strided_slice %24 {offsets = [5, 0], sizes = [1, 128], strides = [1, 1]} : vector<16x128xf32> to vector<1x128xf32>
    %61 = vector.broadcast %59 : vector<8x1xf32> to vector<8x128xf32>
    %62 = vector.broadcast %60 : vector<1x128xf32> to vector<8x128xf32>
    %63 = arith.mulf %61, %62 : vector<8x128xf32>
    %64 = arith.addf %58, %63 : vector<8x128xf32>
    %65 = vector.extract_strided_slice %25 {offsets = [0, 6], sizes = [8, 1], strides = [1, 1]} : vector<8x16xf32> to vector<8x1xf32>
    %66 = vector.extract_strided_slice %24 {offsets = [6, 0], sizes = [1, 128], strides = [1, 1]} : vector<16x128xf32> to vector<1x128xf32>
    %67 = vector.broadcast %65 : vector<8x1xf32> to vector<8x128xf32>
    %68 = vector.broadcast %66 : vector<1x128xf32> to vector<8x128xf32>
    %69 = arith.mulf %67, %68 : vector<8x128xf32>
    %70 = arith.addf %64, %69 : vector<8x128xf32>
    %71 = vector.extract_strided_slice %25 {offsets = [0, 7], sizes = [8, 1], strides = [1, 1]} : vector<8x16xf32> to vector<8x1xf32>
    %72 = vector.extract_strided_slice %24 {offsets = [7, 0], sizes = [1, 128], strides = [1, 1]} : vector<16x128xf32> to vector<1x128xf32>
    %73 = vector.broadcast %71 : vector<8x1xf32> to vector<8x128xf32>
    %74 = vector.broadcast %72 : vector<1x128xf32> to vector<8x128xf32>
    %75 = arith.mulf %73, %74 : vector<8x128xf32>
    %76 = arith.addf %70, %75 : vector<8x128xf32>
    %77 = vector.extract_strided_slice %25 {offsets = [0, 8], sizes = [8, 1], strides = [1, 1]} : vector<8x16xf32> to vector<8x1xf32>
    %78 = vector.extract_strided_slice %24 {offsets = [8, 0], sizes = [1, 128], strides = [1, 1]} : vector<16x128xf32> to vector<1x128xf32>
    %79 = vector.broadcast %77 : vector<8x1xf32> to vector<8x128xf32>
    %80 = vector.broadcast %78 : vector<1x128xf32> to vector<8x128xf32>
    %81 = arith.mulf %79, %80 : vector<8x128xf32>
    %82 = arith.addf %76, %81 : vector<8x128xf32>
    %83 = vector.extract_strided_slice %25 {offsets = [0, 9], sizes = [8, 1], strides = [1, 1]} : vector<8x16xf32> to vector<8x1xf32>
    %84 = vector.extract_strided_slice %24 {offsets = [9, 0], sizes = [1, 128], strides = [1, 1]} : vector<16x128xf32> to vector<1x128xf32>
    %85 = vector.broadcast %83 : vector<8x1xf32> to vector<8x128xf32>
    %86 = vector.broadcast %84 : vector<1x128xf32> to vector<8x128xf32>
    %87 = arith.mulf %85, %86 : vector<8x128xf32>
    %88 = arith.addf %82, %87 : vector<8x128xf32>
    %89 = vector.extract_strided_slice %25 {offsets = [0, 10], sizes = [8, 1], strides = [1, 1]} : vector<8x16xf32> to vector<8x1xf32>
    %90 = vector.extract_strided_slice %24 {offsets = [10, 0], sizes = [1, 128], strides = [1, 1]} : vector<16x128xf32> to vector<1x128xf32>
    %91 = vector.broadcast %89 : vector<8x1xf32> to vector<8x128xf32>
    %92 = vector.broadcast %90 : vector<1x128xf32> to vector<8x128xf32>
    %93 = arith.mulf %91, %92 : vector<8x128xf32>
    %94 = arith.addf %88, %93 : vector<8x128xf32>
    %95 = vector.extract_strided_slice %25 {offsets = [0, 11], sizes = [8, 1], strides = [1, 1]} : vector<8x16xf32> to vector<8x1xf32>
    %96 = vector.extract_strided_slice %24 {offsets = [11, 0], sizes = [1, 128], strides = [1, 1]} : vector<16x128xf32> to vector<1x128xf32>
    %97 = vector.broadcast %95 : vector<8x1xf32> to vector<8x128xf32>
    %98 = vector.broadcast %96 : vector<1x128xf32> to vector<8x128xf32>
    %99 = arith.mulf %97, %98 : vector<8x128xf32>
    %100 = arith.addf %94, %99 : vector<8x128xf32>
    %101 = vector.extract_strided_slice %25 {offsets = [0, 12], sizes = [8, 1], strides = [1, 1]} : vector<8x16xf32> to vector<8x1xf32>
    %102 = vector.extract_strided_slice %24 {offsets = [12, 0], sizes = [1, 128], strides = [1, 1]} : vector<16x128xf32> to vector<1x128xf32>
    %103 = vector.broadcast %101 : vector<8x1xf32> to vector<8x128xf32>
    %104 = vector.broadcast %102 : vector<1x128xf32> to vector<8x128xf32>
    %105 = arith.mulf %103, %104 : vector<8x128xf32>
    %106 = arith.addf %100, %105 : vector<8x128xf32>
    %107 = vector.extract_strided_slice %25 {offsets = [0, 13], sizes = [8, 1], strides = [1, 1]} : vector<8x16xf32> to vector<8x1xf32>
    %108 = vector.extract_strided_slice %24 {offsets = [13, 0], sizes = [1, 128], strides = [1, 1]} : vector<16x128xf32> to vector<1x128xf32>
    %109 = vector.broadcast %107 : vector<8x1xf32> to vector<8x128xf32>
    %110 = vector.broadcast %108 : vector<1x128xf32> to vector<8x128xf32>
    %111 = arith.mulf %109, %110 : vector<8x128xf32>
    %112 = arith.addf %106, %111 : vector<8x128xf32>
    %113 = vector.extract_strided_slice %25 {offsets = [0, 14], sizes = [8, 1], strides = [1, 1]} : vector<8x16xf32> to vector<8x1xf32>
    %114 = vector.extract_strided_slice %24 {offsets = [14, 0], sizes = [1, 128], strides = [1, 1]} : vector<16x128xf32> to vector<1x128xf32>
    %115 = vector.broadcast %113 : vector<8x1xf32> to vector<8x128xf32>
    %116 = vector.broadcast %114 : vector<1x128xf32> to vector<8x128xf32>
    %117 = arith.mulf %115, %116 : vector<8x128xf32>
    %118 = arith.addf %112, %117 : vector<8x128xf32>
    %119 = vector.extract_strided_slice %25 {offsets = [0, 15], sizes = [8, 1], strides = [1, 1]} : vector<8x16xf32> to vector<8x1xf32>
    %120 = vector.extract_strided_slice %24 {offsets = [15, 0], sizes = [1, 128], strides = [1, 1]} : vector<16x128xf32> to vector<1x128xf32>
    %121 = vector.broadcast %119 : vector<8x1xf32> to vector<8x128xf32>
    %122 = vector.broadcast %120 : vector<1x128xf32> to vector<8x128xf32>
    %123 = arith.mulf %121, %122 : vector<8x128xf32>
    %124 = arith.addf %118, %123 : vector<8x128xf32>
    %cst_9 = arith.constant 0.000000e+00 : f32
    %125 = vector.broadcast %cst_9 : f32 to vector<8x128xf32>
    %126 = arith.maximumf %124, %125 : vector<8x128xf32>
    %c0_10 = arith.constant 0 : index
    %c0_11 = arith.constant 0 : index
    %127 = vector.load %arg6[%c0_10, %c0_11] : memref<1x8xf32, #tpu.memory_space<vmem>>, vector<1x8xf32>
    %c0_12 = arith.constant 0 : index
    %c0_13 = arith.constant 0 : index
    %128 = vector.load %arg7[%c0_12, %c0_13] : memref<1x1xf32, #tpu.memory_space<vmem>>, vector<1x1xf32>
    %129 = vector.shape_cast %128 : vector<1x1xf32> to vector<1x1xf32>
    %130 = vector.broadcast %129 : vector<1x1xf32> to vector<1x128xf32>
    %131 = vector.extract_strided_slice %127 {offsets = [0, 0], sizes = [1, 1], strides = [1, 1]} : vector<1x8xf32> to vector<1x1xf32>
    %132 = vector.extract_strided_slice %126 {offsets = [0, 0], sizes = [1, 128], strides = [1, 1]} : vector<8x128xf32> to vector<1x128xf32>
    %133 = vector.broadcast %131 : vector<1x1xf32> to vector<1x128xf32>
    %134 = arith.mulf %133, %132 : vector<1x128xf32>
    %135 = arith.addf %130, %134 : vector<1x128xf32>
    %136 = vector.extract_strided_slice %127 {offsets = [0, 1], sizes = [1, 1], strides = [1, 1]} : vector<1x8xf32> to vector<1x1xf32>
    %137 = vector.extract_strided_slice %126 {offsets = [1, 0], sizes = [1, 128], strides = [1, 1]} : vector<8x128xf32> to vector<1x128xf32>
    %138 = vector.broadcast %136 : vector<1x1xf32> to vector<1x128xf32>
    %139 = arith.mulf %138, %137 : vector<1x128xf32>
    %140 = arith.addf %135, %139 : vector<1x128xf32>
    %141 = vector.extract_strided_slice %127 {offsets = [0, 2], sizes = [1, 1], strides = [1, 1]} : vector<1x8xf32> to vector<1x1xf32>
    %142 = vector.extract_strided_slice %126 {offsets = [2, 0], sizes = [1, 128], strides = [1, 1]} : vector<8x128xf32> to vector<1x128xf32>
    %143 = vector.broadcast %141 : vector<1x1xf32> to vector<1x128xf32>
    %144 = arith.mulf %143, %142 : vector<1x128xf32>
    %145 = arith.addf %140, %144 : vector<1x128xf32>
    %146 = vector.extract_strided_slice %127 {offsets = [0, 3], sizes = [1, 1], strides = [1, 1]} : vector<1x8xf32> to vector<1x1xf32>
    %147 = vector.extract_strided_slice %126 {offsets = [3, 0], sizes = [1, 128], strides = [1, 1]} : vector<8x128xf32> to vector<1x128xf32>
    %148 = vector.broadcast %146 : vector<1x1xf32> to vector<1x128xf32>
    %149 = arith.mulf %148, %147 : vector<1x128xf32>
    %150 = arith.addf %145, %149 : vector<1x128xf32>
    %151 = vector.extract_strided_slice %127 {offsets = [0, 4], sizes = [1, 1], strides = [1, 1]} : vector<1x8xf32> to vector<1x1xf32>
    %152 = vector.extract_strided_slice %126 {offsets = [4, 0], sizes = [1, 128], strides = [1, 1]} : vector<8x128xf32> to vector<1x128xf32>
    %153 = vector.broadcast %151 : vector<1x1xf32> to vector<1x128xf32>
    %154 = arith.mulf %153, %152 : vector<1x128xf32>
    %155 = arith.addf %150, %154 : vector<1x128xf32>
    %156 = vector.extract_strided_slice %127 {offsets = [0, 5], sizes = [1, 1], strides = [1, 1]} : vector<1x8xf32> to vector<1x1xf32>
    %157 = vector.extract_strided_slice %126 {offsets = [5, 0], sizes = [1, 128], strides = [1, 1]} : vector<8x128xf32> to vector<1x128xf32>
    %158 = vector.broadcast %156 : vector<1x1xf32> to vector<1x128xf32>
    %159 = arith.mulf %158, %157 : vector<1x128xf32>
    %160 = arith.addf %155, %159 : vector<1x128xf32>
    %161 = vector.extract_strided_slice %127 {offsets = [0, 6], sizes = [1, 1], strides = [1, 1]} : vector<1x8xf32> to vector<1x1xf32>
    %162 = vector.extract_strided_slice %126 {offsets = [6, 0], sizes = [1, 128], strides = [1, 1]} : vector<8x128xf32> to vector<1x128xf32>
    %163 = vector.broadcast %161 : vector<1x1xf32> to vector<1x128xf32>
    %164 = arith.mulf %163, %162 : vector<1x128xf32>
    %165 = arith.addf %160, %164 : vector<1x128xf32>
    %166 = vector.extract_strided_slice %127 {offsets = [0, 7], sizes = [1, 1], strides = [1, 1]} : vector<1x8xf32> to vector<1x1xf32>
    %167 = vector.extract_strided_slice %126 {offsets = [7, 0], sizes = [1, 128], strides = [1, 1]} : vector<8x128xf32> to vector<1x128xf32>
    %168 = vector.broadcast %166 : vector<1x1xf32> to vector<1x128xf32>
    %169 = arith.mulf %168, %167 : vector<1x128xf32>
    %170 = arith.addf %165, %169 : vector<1x128xf32>
    %c0_14 = arith.constant 0 : index
    %c0_15 = arith.constant 0 : index
    %171 = vector.load %arg8[%c0_14, %c0_15] : memref<1x128xf32, #tpu.memory_space<vmem>>, vector<1x128xf32>
    tpu.vector_store %arg8[%c0_14, %c0_15], %170 {strides = array<i32>} : memref<1x128xf32, #tpu.memory_space<vmem>>, vector<1x128xf32>,
    return
  }
  func.func @transform_0(%arg0: i32) -> (i32, i32) {
    %c0_i32 = arith.constant 0 : i32
    %c0_i32_0 = arith.constant 0 : i32
    return %c0_i32, %arg0 : i32, i32
  }
  func.func @transform_1(%arg0: i32) -> (i32, i32) {
    %c0_i32 = arith.constant 0 : i32
    %c0_i32_0 = arith.constant 0 : i32
    %c0_i32_1 = arith.constant 0 : i32
    return %c0_i32, %c0_i32_0 : i32, i32
  }
  func.func @transform_2(%arg0: i32) -> (i32, i32) {
    %c0_i32 = arith.constant 0 : i32
    %c0_i32_0 = arith.constant 0 : i32
    %c0_i32_1 = arith.constant 0 : i32
    return %c0_i32, %c0_i32_0 : i32, i32
  }
  func.func @transform_3(%arg0: i32) -> (i32, i32) {
    %c0_i32 = arith.constant 0 : i32
    %c0_i32_0 = arith.constant 0 : i32
    %c0_i32_1 = arith.constant 0 : i32
    return %c0_i32, %c0_i32_0 : i32, i32
  }
  func.func @transform_4(%arg0: i32) -> (i32, i32) {
    %c0_i32 = arith.constant 0 : i32
    %c0_i32_0 = arith.constant 0 : i32
    %c0_i32_1 = arith.constant 0 : i32
    return %c0_i32, %c0_i32_0 : i32, i32
  }
  func.func @transform_5(%arg0: i32) -> (i32, i32) {
    %c0_i32 = arith.constant 0 : i32
    %c0_i32_0 = arith.constant 0 : i32
    %c0_i32_1 = arith.constant 0 : i32
    return %c0_i32, %c0_i32_0 : i32, i32
  }
  func.func @transform_6(%arg0: i32) -> (i32, i32) {
    %c0_i32 = arith.constant 0 : i32
    %c0_i32_0 = arith.constant 0 : i32
    %c0_i32_1 = arith.constant 0 : i32
    return %c0_i32, %c0_i32_0 : i32, i32
  }
  func.func @transform_7(%arg0: i32) -> (i32, i32) {
    %c0_i32 = arith.constant 0 : i32
    %c0_i32_0 = arith.constant 0 : i32
    return %c0_i32, %arg0 : i32, i32
  }
}

</mosaic_0001>

<bundles_post_ra>
// kernel: tpu_custom_call.1
= control target key start
LH: loop header
LB: loop body
LE: loop exit
PB: predicated region body
PF: predicated region fallthrough
CT: control target
= control target key end

     0   :  { %s479_s0 = inlined_call_operand.vmem [shape: f32[3,128], index: 0, kind: input, shape index: {}]   ;;  %s480_s1 = inlined_call_operand.vmem [shape: f32[16,3], index: 1, kind: input, shape index: {}]   ;;  %s481_s2 = inlined_call_operand.vmem [shape: f32[16,1], index: 2, kind: input, shape index: {}]   ;;  %s482_s3 = inlined_call_operand.vmem [shape: f32[8,16], index: 3, kind: input, shape index: {}]   ;;  %s483_s4 = inlined_call_operand.vmem [shape: f32[8,1], index: 4, kind: input, shape index: {}]   ;;  %s484_s5 = inlined_call_operand.vmem [shape: f32[1,8], index: 5, kind: input, shape index: {}]   ;;  %s485_s6 = inlined_call_operand.<no memory space> [shape: f32[1,1], index: 6, kind: input, shape index: {}]   ;;  %s486_s7 = inlined_call_operand.hbm [shape: f32[1,128], index: 7, kind: output, shape index: {}]  }
   0x1   :  { %v12_v0 = vstv %s485_s6 }
   0x2   :  { %13 = vst [vmem:[#allocation2] sm:$0x1] %v12_v0 }
   0x3   :  { %v32_v1 = vld [vmem:[%s481_s2] sm:$0xff]  ;;  %v384_v3 = vmov 1   ;;  %v385_v4 = vmov 0  }
   0x4   :  { %v30_v2 = vld [vmem:[%s480_s1] sm:$0xff]  ;;  %330 = vset.pattern.permute.xlu2 %v384_v3  ;;  %329 = vset.pattern.permute.xlu1 %v385_v4 }
   0x5   :  { %328 = vset.pattern.permute.xlu0 %v385_v4  ;;  %60 = vperm.xlu2 %330, %v30_v2  }
   0x6   :  { %14 = vsyncpa [#allocation4], 0  ;;  %36 = vperm.xlu0 %328, %v32_v1   ;;  %46 = vperm.xlu1 %329, %v30_v2   ;;  %v31_v5 = vld [vmem:[%s480_s1 + $0x8] sm:$0xff]  ;;  %v88_v7 = vld [vmem:[%s483_s4] sm:$0xff]  ;;  %v386_v8 = vmov 2   ;;  %v387_v10 = vmov 5  }
   0x7   :  { %v33_v6 = vld [vmem:[%s481_s2 + $0x8] sm:$0xff]  ;;  %v87_v9 = vld [vmem:[%s482_s3] sm:$0xff]  ;;  %v388_v11 = vmov 4   ;;  %v389_v12 = vmov 3   ;;  %v390_v13 = vmov 10   ;;  %v391_v14 = vmov 7  }
   0x8   :  { %v392_v15 = vmov 6   ;;  %v393_v16 = vmov 15   ;;  %v394_v17 = vmov 9   ;;  %v395_v18 = vmov 8   ;;  %v208_v19 = vld [vmem:[%s484_s5] sm:$0x1] }
   0x9   :  { %v396_v20 = vmov 12   ;;  %v397_v21 = vmov 11   ;;  %v398_v22 = vmov 14   ;;  %v399_v23 = vmov 13   ;;  %v209_v24 = vld [vmem:[#allocation2] sm:$0x1] }
   0xa   :  { %v29_v29 = vld [vmem:[%s479_s0] sm:$0x7]  ;;  %s400_s0 = smov [#allocation3]   ;;  %s302_s16 = sshll.u32 %s486_s7, 4  ;;  %s303_s16 = int_to_ptr.hbm [resolvable:$true] %s302_s16 }
   0xb   :  { %v54_v31 = vperm.slane %v29_v29, 0  ;;  %v67_v34 = vperm.slane %v29_v29, 1  ;;  %v80_v38 = vperm.slane %v29_v29, 2  ;;  %s300_s13 = sshll.u32 %s400_s0, 4  ;;  %s301_s13 = int_to_ptr.vmem [resolvable:$true] %s300_s13 }
   0xd   :  { %64 = vperm.xlu2 %330, %v31_v5  }
   0xe   :  { %41 = vperm.xlu0 %328, %v33_v6   ;;  %51 = vperm.xlu1 %329, %v31_v5  }
  0x15   :  { %333 = vset.pattern.permute.xlu2 %v385_v4 }
  0x16   :  { %331 = vset.pattern.permute.xlu0 %v386_v8  ;;  %332 = vset.pattern.permute.xlu1 %v386_v8 }
  0x17   :  { %73 = vperm.xlu0 %331, %v30_v2   ;;  %91 = vperm.xlu2 %333, %v88_v7  }
  0x18   :  { %77 = vperm.xlu1 %332, %v31_v5  }
  0x1f   :  { %110 = vperm.xlu0 %331, %v87_v9   ;;  %335 = vset.pattern.permute.xlu2 %v384_v3 }
  0x20   :  { %334 = vset.pattern.permute.xlu1 %v385_v4  ;;  %103 = vperm.xlu2 %335, %v87_v9  }
  0x21   :  { %96 = vperm.xlu1 %334, %v87_v9  }
  0x27   :  { %338 = vset.pattern.permute.xlu0 %v387_v10 }
  0x28   :  { %131 = vperm.xlu0 %338, %v87_v9   ;;  %337 = vset.pattern.permute.xlu2 %v388_v11 }
  0x29   :  { %336 = vset.pattern.permute.xlu1 %v389_v12  ;;  %124 = vperm.xlu2 %337, %v87_v9  }
  0x2a   :  { %117 = vperm.xlu1 %336, %v87_v9  }
  0x30   :  { %343 = vset.pattern.permute.xlu0 %v390_v13 }
  0x31   :  { %166 = vperm.xlu0 %343, %v87_v9   ;;  %340 = vset.pattern.permute.xlu2 %v391_v14 }
  0x32   :  { %339 = vset.pattern.permute.xlu1 %v392_v15  ;;  %145 = vperm.xlu2 %340, %v87_v9  }
  0x33   :  { %138 = vperm.xlu1 %339, %v87_v9  }
  0x39   :  { %348 = vset.pattern.permute.xlu0 %v393_v16 }
  0x3a   :  { %201 = vperm.xlu0 %348, %v87_v9   ;;  %342 = vset.pattern.permute.xlu2 %v394_v17 }
  0x3b   :  { %341 = vset.pattern.permute.xlu1 %v395_v18  ;;  %159 = vperm.xlu2 %342, %v87_v9  }
  0x3c   :  { %152 = vperm.xlu1 %341, %v87_v9  }
  0x42   :  { %352 = vset.pattern.permute.xlu0 %v389_v12 }
  0x43   :  { %345 = vset.pattern.permute.xlu2 %v396_v20  ;;  %245 = vperm.xlu0 %352, %v208_v19  }
  0x44   :  { %344 = vset.pattern.permute.xlu1 %v397_v21  ;;  %180 = vperm.xlu2 %345, %v87_v9  }
  0x45   :  { %173 = vperm.xlu1 %344, %v87_v9  }
  0x4b   :  { %357 = vset.pattern.permute.xlu0 %v391_v14 }
  0x4c   :  { %347 = vset.pattern.permute.xlu2 %v398_v22 }
  0x4d   :  { %346 = vset.pattern.permute.xlu1 %v399_v23  ;;  %194 = vperm.xlu2 %347, %v87_v9  }
  0x4e   :  { %187 = vperm.xlu1 %346, %v87_v9  }
  0x55   :  { %350 = vset.pattern.permute.xlu2 %v384_v3 }
  0x56   :  { %349 = vset.pattern.permute.xlu1 %v385_v4  ;;  %225 = vperm.xlu2 %350, %v208_v19  }
  0x57   :  { %218 = vperm.xlu1 %349, %v208_v19  }
  0x5e   :  { %351 = vset.pattern.permute.xlu2 %v386_v8 }
  0x5f   :  { %212 = vperm.xlu1 %349, %v209_v24   ;;  %235 = vperm.xlu2 %351, %v208_v19   ;;  %v61_v25 = vpop.permute.xlu2 %60 }
  0x60   :  { %v68_v36 = vmul.f32 %v67_v34, %v61_v25 }
  0x67   :  { %353 = vset.pattern.permute.xlu1 %v388_v11  ;;  %354 = vset.pattern.permute.xlu2 %v387_v10  ;;  %v65_v26 = vpop.permute.xlu2 %64 }
  0x68   :  { %255 = vperm.xlu1 %353, %v208_v19   ;;  %265 = vperm.xlu2 %354, %v208_v19   ;;  %v69_v63 = vmul.f32 %v67_v34, %v65_v26 }
  0x70   :  { %355 = vset.pattern.permute.xlu1 %v392_v15  ;;  %356 = vset.pattern.permute.xlu2 %v391_v14 }
  0x71   :  { %275 = vperm.xlu1 %355, %v208_v19   ;;  %285 = vperm.xlu2 %356, %v208_v19   ;;  %v92_v30 = vpop.permute.xlu2 %91 }
  0x78   :  { %v47_v27 = vpop.permute.xlu1 %46  ;;  %v37_v28 = vpop.permute.xlu0 %36 }
  0x79   :  { %v55_v35 = vmul.f32 %v54_v31, %v47_v27 }
  0x7a   :  { %v104_v39 = vpop.permute.xlu2 %103 }
  0x7b   :  { %v57_v37 = vadd.f32 %v55_v35, %v37_v28 }
  0x7d   :  { %v70_v41 = vadd.f32 %v68_v36, %v57_v37 }
  0x80   :  { %v52_v32 = vpop.permute.xlu1 %51  ;;  %v42_v33 = vpop.permute.xlu0 %41 }
  0x81   :  { %v56_v53 = vmul.f32 %v54_v31, %v52_v32 }
  0x83   :  { %v125_v46 = vpop.permute.xlu2 %124  ;;  %v58_v60 = vadd.f32 %v56_v53, %v42_v33 }
  0x85   :  { %v71_v3 = vadd.f32 %v69_v63, %v58_v60 }
  0x89   :  { %v74_v40 = vpop.permute.xlu0 %73 }
  0x8a   :  { %v81_v42 = vmul.f32 %v80_v38, %v74_v40  ;;  %v78_v43 = vpop.permute.xlu1 %77 }
  0x8b   :  { %v82_v0 = vmul.f32 %v80_v38, %v78_v43 }
  0x8c   :  { %v83_v44 = vadd.f32 %v81_v42, %v70_v41  ;;  %v146_v52 = vpop.permute.xlu2 %145 }
  0x8d   :  { %v84_v7 = vadd.f32 %v82_v0, %v71_v3 }
  0x8e   :  { %v85_v45 = vmax.f32 %v83_v44, 0.0 }
  0x8f   :  { %v86_v13 = vmax.f32 %v84_v7, 0.0 }
  0x90   :  { %v99_v47 = vperm.slane %v85_v45, 0  ;;  %v106_v50 = vperm.slane %v85_v45, 1  ;;  %v113_v54 = vperm.slane %v85_v45, 2  ;;  %v120_v59 = vperm.slane %v85_v45, 3 }
  0x91   :  { %v111_v57 = vpop.permute.xlu0 %110  ;;  %v127_v2 = vperm.slane %v85_v45, 4  ;;  %v134_v10 = vperm.slane %v85_v45, 5  ;;  %v141_v12 = vperm.slane %v85_v45, 6  ;;  %v148_v16 = vperm.slane %v85_v45, 7 }
  0x92   :  { %v107_v55 = vmul.f32 %v106_v50, %v104_v39  ;;  %v114_v61 = vmul.f32 %v113_v54, %v111_v57  ;;  %v155_v20 = vperm.slane %v86_v13, 0  ;;  %v162_v25 = vperm.slane %v86_v13, 1 }
  0x93   :  { %v97_v48 = vpop.permute.xlu1 %96  ;;  %v128_v8 = vmul.f32 %v127_v2, %v125_v46  ;;  %v149_v22 = vmul.f32 %v148_v16, %v146_v52  ;;  %v176_v32 = vperm.slane %v86_v13, 3  ;;  %v183_v37 = vperm.slane %v86_v13, 4 }
  0x94   :  { %v100_v49 = vmul.f32 %v99_v47, %v97_v48  ;;  %v190_v39 = vperm.slane %v86_v13, 5  ;;  %v197_v45 = vperm.slane %v86_v13, 6 }
  0x95   :  { %v160_v5 = vpop.permute.xlu2 %159 }
  0x96   :  { %v101_v51 = vadd.f32 %v100_v49, %v92_v30  ;;  %v163_v27 = vmul.f32 %v162_v25, %v160_v5  ;;  %v169_v30 = vperm.slane %v86_v13, 2  ;;  %v204_v49 = vperm.slane %v86_v13, 7 }
  0x98   :  { %v108_v58 = vadd.f32 %v107_v55, %v101_v51 }
  0x9a   :  { %v115_v1 = vadd.f32 %v114_v61, %v108_v58  ;;  %v132_v9 = vpop.permute.xlu0 %131 }
  0x9b   :  { %v135_v14 = vmul.f32 %v134_v10, %v132_v9 }
  0x9c   :  { %v118_v56 = vpop.permute.xlu1 %117 }
  0x9d   :  { %v121_v62 = vmul.f32 %v120_v59, %v118_v56 }
  0x9e   :  { %v181_v21 = vpop.permute.xlu2 %180 }
  0x9f   :  { %v122_v4 = vadd.f32 %v121_v62, %v115_v1  ;;  %v184_v40 = vmul.f32 %v183_v37, %v181_v21 }
  0xa1   :  { %v129_v11 = vadd.f32 %v128_v8, %v122_v4 }
  0xa3   :  { %v136_v17 = vadd.f32 %v135_v14, %v129_v11  ;;  %v167_v28 = vpop.permute.xlu0 %166 }
  0xa4   :  { %v170_v34 = vmul.f32 %v169_v30, %v167_v28 }
  0xa5   :  { %v139_v6 = vpop.permute.xlu1 %138 }
  0xa6   :  { %v142_v15 = vmul.f32 %v141_v12, %v139_v6 }
  0xa7   :  { %v195_v33 = vpop.permute.xlu2 %194 }
  0xa8   :  { %v143_v18 = vadd.f32 %v142_v15, %v136_v17  ;;  %v198_v47 = vmul.f32 %v197_v45, %v195_v33 }
  0xaa   :  { %v150_v24 = vadd.f32 %v149_v22, %v143_v18 }
  0xac   :  { %v202_v48 = vpop.permute.xlu0 %201 }
  0xad   :  { %v205_v52 = vmul.f32 %v204_v49, %v202_v48 }
  0xae   :  { %v153_v19 = vpop.permute.xlu1 %152 }
  0xaf   :  { %v156_v23 = vmul.f32 %v155_v20, %v153_v19 }
  0xb0   :  { %v226_v42 = vpop.permute.xlu2 %225 }
  0xb1   :  { %v157_v26 = vadd.f32 %v156_v23, %v150_v24  ;;  %v228_v55 = vperm.slane %v226_v42, 0 }
  0xb3   :  { %v164_v31 = vadd.f32 %v163_v27, %v157_v26 }
  0xb5   :  { %v171_v36 = vadd.f32 %v170_v34, %v164_v31  ;;  %v246_v0 = vpop.permute.xlu0 %245 }
  0xb6   :  { %v248_v2 = vperm.slane %v246_v0, 0 }
  0xb7   :  { %v174_v29 = vpop.permute.xlu1 %173 }
  0xb8   :  { %v177_v35 = vmul.f32 %v176_v32, %v174_v29 }
  0xb9   :  { %v236_v53 = vpop.permute.xlu2 %235 }
  0xba   :  { %v178_v38 = vadd.f32 %v177_v35, %v171_v36  ;;  %v238_v60 = vperm.slane %v236_v53, 0 }
  0xbc   :  { %v185_v44 = vadd.f32 %v184_v40, %v178_v38 }
  0xc0   :  { %v188_v41 = vpop.permute.xlu1 %187 }
  0xc1   :  { %v191_v43 = vmul.f32 %v190_v39, %v188_v41 }
  0xc2   :  { %v266_v63 = vpop.permute.xlu2 %265 }
  0xc3   :  { %v192_v46 = vadd.f32 %v191_v43, %v185_v44  ;;  %v268_v11 = vperm.slane %v266_v63, 0 }
  0xc5   :  { %v199_v50 = vadd.f32 %v198_v47, %v192_v46 }
  0xc7   :  { %v206_v54 = vadd.f32 %v205_v52, %v199_v50 }
  0xc9   :  { %v219_v51 = vpop.permute.xlu1 %218  ;;  %v207_v56 = vmax.f32 %v206_v54, 0.0 }
  0xca   :  { %v221_v57 = vperm.slane %v219_v51, 0 }
  0xcb   :  { %v229_v62 = vmul.f32 %v228_v55, %v207_v56  ;;  %v239_v4 = vmul.f32 %v238_v60, %v207_v56  ;;  %v249_v8 = vmul.f32 %v248_v2, %v207_v56  ;;  %v286_v13 = vpop.permute.xlu2 %285  ;;  %v269_v16 = vmul.f32 %v268_v11, %v207_v56 }
  0xcc   :  { %v222_v61 = vmul.f32 %v221_v57, %v207_v56  ;;  %v288_v17 = vperm.slane %v286_v13, 0 }
  0xcd   :  { %v231_v3 = vrot.slane %v229_v62, 1  ;;  %v241_v9 = vrot.slane %v239_v4, 2  ;;  %v251_v14 = vrot.slane %v249_v8, 3  ;;  %v271_v22 = vrot.slane %v269_v16, 5 }
  0xce   :  { %v289_v23 = vmul.f32 %v288_v17, %v207_v56 }
  0xd0   :  { %v291_v27 = vrot.slane %v289_v23, 7 }
  0xd1   :  { %v213_v58 = vpop.permute.xlu1 %212 }
  0xd2   :  { %v215_v59 = vperm.slane %v213_v58, 0 }
  0xd4   :  { %v223_v1 = vadd.f32 %v222_v61, %v215_v59 }
  0xd6   :  { %v233_v5 = vadd.f32 %v231_v3, %v223_v1 }
  0xd8   :  { %v243_v12 = vadd.f32 %v241_v9, %v233_v5 }
  0xda   :  { %v256_v6 = vpop.permute.xlu1 %255  ;;  %v253_v18 = vadd.f32 %v251_v14, %v243_v12 }
  0xdb   :  { %v258_v7 = vperm.slane %v256_v6, 0 }
  0xdd   :  { %v259_v10 = vmul.f32 %v258_v7, %v207_v56 }
  0xdf   :  { %v261_v15 = vrot.slane %v259_v10, 4 }
  0xe1   :  { %v263_v20 = vadd.f32 %v261_v15, %v253_v18 }
  0xe3   :  { %v276_v19 = vpop.permute.xlu1 %275  ;;  %v273_v25 = vadd.f32 %v271_v22, %v263_v20 }
  0xe4   :  { %v278_v21 = vperm.slane %v276_v19, 0 }
  0xe6   :  { %v279_v24 = vmul.f32 %v278_v21, %v207_v56 }
  0xe8   :  { %v281_v26 = vrot.slane %v279_v24, 6 }
  0xea   :  { %v283_v28 = vadd.f32 %v281_v26, %v273_v25 }
  0xec   :  { %v293_v29 = vadd.f32 %v291_v27, %v283_v28 }
  0xee   :  { %294 = vst [vmem:[#allocation3] sm:$0x1] %v293_v29 }
  0xef   :  { %305 = dma.vmem_to_hbm [thread:$0]  %s301_s13, 16, %s303_s16, [#allocation4]  }
  0xf0   :  { %382 = dma.done.wait [#allocation4], 16  }
  0xf1   :  { %383 = vsyncadd [#allocation4], 4294967280 }
  0xf2   :  { %310 = vsyncpa [#allocation4], 1 }

</bundles_post_ra>
